<compile_context>
chip_gen: v7x
topology: tpu7x:2x2x1
jax: 0.10.0
libtpu: 0.0.40
codegen_flags: <defaults>
</compile_context>

<pallas_src>
import jax
import jax.numpy as jnp
from jax.experimental import pallas as pl
from jax.experimental.pallas import tpu as pltpu

LEAKY_SLOPE = 0.01
BN_EPS = 1e-5


def _leaky_relu(x):
    # Valid for slope in [0, 1]: max(x, slope * x) == leaky_relu(x).
    return jnp.maximum(x, LEAKY_SLOPE * x)


def _round8(n):
    return ((n + 7) // 8) * 8


def _make_critic_kernel(S, A, H0, H1, H2, offsets):
    """Build the fused forward kernel with all shapes / offsets baked in."""
    o1 = offsets["o1"]
    o2s = offsets["o2s"]
    o2a = offsets["o2a"]
    o3 = offsets["o3"]
    ov = offsets["ov"]

    def kernel(state_ref, action_ref, w_ref, out_ref):
        state = state_ref[...]            # (B, S)
        action = action_ref[...]          # (B, A)

        # Static slices of the packed blob (sublane-aligned matrix blocks).
        w1 = w_ref[o1:o1 + S, :H0]        # (S, H0)
        w2s = w_ref[o2s:o2s + H0, :H1]    # (H0, H1)
        w3 = w_ref[o3:o3 + H1, :H2]       # (H1, H2)

        # Vector params: one per sublane row, lane-0 aligned.
        b1 = w_ref[ov + 0:ov + 1, :H0]    # (1, H0)
        gamma = w_ref[ov + 1:ov + 2, :H0]
        beta = w_ref[ov + 2:ov + 3, :H0]
        b2 = w_ref[ov + 3:ov + 4, :H1]
        b3 = w_ref[ov + 4:ov + 5, :H2]
        w4 = w_ref[ov + 5:ov + 6, :H2]    # fc4 weight as a (1, H2) row
        b4 = w_ref[ov + 6:ov + 7, 0:1]    # (1, 1)

        # ---- fcs1 + BatchNorm1d (training mode, biased batch stats) ----
        h1 = jnp.dot(state, w1, preferred_element_type=jnp.float32) + b1
        inv_b = jnp.float32(1.0 / state.shape[0])
        mean = jnp.sum(h1, axis=0, keepdims=True) * inv_b
        d = h1 - mean
        var = jnp.sum(d * d, axis=0, keepdims=True) * inv_b   # two-pass: no cancellation
        xs = _leaky_relu(d * jax.lax.rsqrt(var + BN_EPS) * gamma + beta)

        # ---- fc2 on cat(xs, action): xs part on MXU, action part (K=A) on VPU ----
        h2 = jnp.dot(xs, w2s, preferred_element_type=jnp.float32) + b2
        for k in range(A):  # unrolled VPU multiply-accumulate (static)
            h2 = h2 + action[:, k:k + 1] * w_ref[o2a + k:o2a + k + 1, :H1]
        h2 = _leaky_relu(h2)

        # ---- fc3 ----
        h3 = _leaky_relu(jnp.dot(h2, w3, preferred_element_type=jnp.float32) + b3)

        # ---- fc4 (N=1): VPU multiply + lane reduce ----
        out_ref[...] = jnp.sum(h3 * w4, axis=-1, keepdims=True) + b4

    return kernel


def pack_critic_params(params, state_size, action_size, critic_units):
    """Pack all parameters of ONE critic into a single (R, C) f32 blob (init-time)."""
    H0, H1, H2 = critic_units
    S, A = state_size, action_size

    o1 = 0
    o2s = _round8(S)
    o2a = o2s + _round8(H0)
    o3 = o2a + _round8(A)
    ov = o3 + _round8(H1)            # start of the 7 vector rows
    R = _round8(ov + 7)
    C = 128 * ((max(H0, H1, H2, 1) + 127) // 128)   # lane-pad to full 128 tiles

    blob = jnp.zeros((R, C), jnp.float32)
    blob = blob.at[o1:o1 + S, :H0].set(params["w1"])
    blob = blob.at[o2s:o2s + H0, :H1].set(params["w2"][:H0])
    blob = blob.at[o2a:o2a + A, :H1].set(params["w2"][H0:])
    blob = blob.at[o3:o3 + H1, :H2].set(params["w3"])
    blob = blob.at[ov + 0, :H0].set(params["b1"][0])
    blob = blob.at[ov + 1, :H0].set(params["gamma"][0])
    blob = blob.at[ov + 2, :H0].set(params["beta"][0])
    blob = blob.at[ov + 3, :H1].set(params["b2"][0])
    blob = blob.at[ov + 4, :H2].set(params["b3"][0])
    blob = blob.at[ov + 5, :H2].set(params["w4"][:, 0])
    blob = blob.at[ov + 6, 0].set(params["b4"][0, 0])

    offsets = {"o1": o1, "o2s": o2s, "o2a": o2a, "o3": o3, "ov": ov}
    return blob, offsets


def critic_forward(state, action, blobs, state_size, action_size,
                   critic_units, offsets):
    """state: (B, S), action: (B, A) f32.

    blobs: (R, C)     -> single critic,  returns (B, 1)
           (N, R, C)  -> N stacked critics (online/target/twin), returns (N, B, 1)
    """
    B = state.shape[0]
    H0, H1, H2 = critic_units
    kernel = _make_critic_kernel(state_size, action_size, H0, H1, H2, offsets)
    vmem = pltpu.MemorySpace.VMEM

    if blobs.ndim == 2:
        # Single network: gridless call, everything resident in VMEM, no pipeline.
        return pl.pallas_call(
            kernel,
            out_shape=jax.ShapeDtypeStruct((B, 1), jnp.float32),
            in_specs=[pl.BlockSpec(memory_space=vmem)] * 3,
            out_specs=pl.BlockSpec(memory_space=vmem),
        )(state, action, blobs)

    # Multiple networks sharing one launch: state/action pinned to block 0
    # (DMA'd once, resident across the grid); per-network blob streamed in.
    N, R, C = blobs.shape
    return pl.pallas_call(
        kernel,
        out_shape=jax.ShapeDtypeStruct((N, B, 1), jnp.float32),
        grid=(N,),
        in_specs=[
            pl.BlockSpec((B, state_size), lambda n: (0, 0)),
            pl.BlockSpec((B, action_size), lambda n: (0, 0)),
            pl.BlockSpec((pl.Squeezed(), R, C), lambda n: (n, 0, 0)),
        ],
        out_specs=pl.BlockSpec((pl.Squeezed(), B, 1), lambda n: (n, 0, 0)),
        compiler_params=pltpu.CompilerParams(
            dimension_semantics=("parallel",)),   # v7x: shard critics across TCs
    )(state, action, blobs)


def init_critic_params(key, state_size, action_size, critic_units):
    """Parameter init mirroring the module's shapes.

    PyTorch Linear weights are (out, in); stored transposed here (in, out).
    hidden_init uses lim = 1/sqrt(weight.size(0)) = 1/sqrt(out_features).
    fc4 weights uniform(-3e-3, 3e-3). BatchNorm1d affine: weight=1, bias=0.
    """
    h0, h1, h2 = critic_units
    ks = jax.random.split(key, 8)

    def lin(kw, kb, fan_in, fan_out, lim):
        w = jax.random.uniform(kw, (fan_in, fan_out), jnp.float32, -lim, lim)
        blim = 1.0 / (fan_in ** 0.5)
        b = jax.random.uniform(kb, (1, fan_out), jnp.float32, -blim, blim)
        return w, b

    w1, b1 = lin(ks[0], ks[1], state_size, h0, 1.0 / (h0 ** 0.5))
    w2, b2 = lin(ks[2], ks[3], h0 + action_size, h1, 1.0 / (h1 ** 0.5))
    w3, b3 = lin(ks[4], ks[5], h1, h2, 1.0 / (h2 ** 0.5))
    w4, b4 = lin(ks[6], ks[7], h2, 1, 3e-3)

    return {
        "w1": w1, "b1": b1,
        "gamma": jnp.ones((1, h0), jnp.float32),
        "beta": jnp.zeros((1, h0), jnp.float32),
        "w2": w2, "b2": b2,
        "w3": w3, "b3": b3,
        "w4": w4, "b4": b4,
    }


def critic_reference(state, action, params):
    """Pure-JAX reference (explicit concat, two-pass variance)."""
    h1 = state @ params["w1"] + params["b1"]
    mean = h1.mean(0, keepdims=True)
    var = ((h1 - mean) ** 2).mean(0, keepdims=True)
    h1n = (h1 - mean) / jnp.sqrt(var + BN_EPS) * params["gamma"] + params["beta"]
    xs = jnp.where(h1n > 0, h1n, LEAKY_SLOPE * h1n)
    x = jnp.concatenate([xs, action], axis=1)
    h2 = x @ params["w2"] + params["b2"]
    h2 = jnp.where(h2 > 0, h2, LEAKY_SLOPE * h2)
    h3 = h2 @ params["w3"] + params["b3"]
    h3 = jnp.where(h3 > 0, h3, LEAKY_SLOPE * h3)
    return h3 @ params["w4"] + params["b4"]


if __name__ == "__main__":
    B = 8
    state_size = 16
    action_size = 4
    critic_units = (32, 32, 16)

    key = jax.random.PRNGKey(0)
    k_state, k_action, k_p1, k_p2 = jax.random.split(key, 4)

    state = jax.random.normal(k_state, (B, state_size), jnp.float32)
    action = jax.random.normal(k_action, (B, action_size), jnp.float32)

    # Two critics (e.g. online + target) sharing one launch / one state DMA.
    params_list = [
        init_critic_params(k_p1, state_size, action_size, critic_units),
        init_critic_params(k_p2, state_size, action_size, critic_units),
    ]
    blobs_and_offsets = [
        pack_critic_params(p, state_size, action_size, critic_units)
        for p in params_list
    ]
    offsets = blobs_and_offsets[0][1]
    blobs = jnp.stack([b for b, _ in blobs_and_offsets], axis=0)   # (2, R, C)

    # Multi-network path (grid over networks, "parallel" for v7x megacore).
    q_all = critic_forward(state, action, blobs, state_size, action_size,
                           critic_units, offsets)
    q_all = jax.block_until_ready(q_all)
    assert q_all.shape == (2, B, 1)

    # Single-network gridless path.
    q_single = critic_forward(state, action, blobs_and_offsets[0][0],
                              state_size, action_size, critic_units, offsets)
    q_single = jax.block_until_ready(q_single)
    assert q_single.shape == (B, 1)

    for i, p in enumerate(params_list):
        q_ref = critic_reference(state, action, p)
        assert jnp.allclose(q_all[i], q_ref, atol=1e-4, rtol=1e-4), \
            f"mismatch vs reference (network {i})"
    assert jnp.allclose(q_single, q_all[0], atol=1e-5, rtol=1e-5), \
        "gridless path disagrees with multi-network path"

    print("KERNEL_OK")
</pallas_src>

<mosaic_0001>
module attributes {stable_mosaic.version = 11 : i64} {
  func.func @kernel(%arg0: i32, %arg1: memref<8x16xf32, #tpu.memory_space<vmem>>, %arg2: memref<8x4xf32, #tpu.memory_space<vmem>>, %arg3: memref<1x96x128xf32, #tpu.memory_space<vmem>>, %arg4: memref<1x8x1xf32, #tpu.memory_space<vmem>>) attributes {dimension_semantics = [#tpu.dimension_semantics<parallel>], iteration_bounds = array<i64: 2>, scalar_prefetch = 0 : i64, scratch_operands = 0 : i64, tpu.core_type = #tpu.core_type<tc>, window_params = [{pipeline_mode = #tpu.pipeline_mode<synchronous>, transform_indices = @transform_0, window_bounds = array<i64: 8, 16>}, {pipeline_mode = #tpu.pipeline_mode<synchronous>, transform_indices = @transform_1, window_bounds = array<i64: 8, 4>}, {transform_indices = @transform_2, window_bounds = array<i64: 1, 96, 128>}, {transform_indices = @transform_3, window_bounds = array<i64: 1, 8, 1>}]} {
    %c0 = arith.constant 0 : index
    %c0_0 = arith.constant 0 : index
    %0 = vector.load %arg1[%c0, %c0_0] : memref<8x16xf32, #tpu.memory_space<vmem>>, vector<8x16xf32>
    %c0_1 = arith.constant 0 : index
    %c0_2 = arith.constant 0 : index
    %1 = vector.load %arg2[%c0_1, %c0_2] : memref<8x4xf32, #tpu.memory_space<vmem>>, vector<8x4xf32>
    %c0_3 = arith.constant 0 : index
    %c0_4 = arith.constant 0 : index
    %c0_5 = arith.constant 0 : index
    %2 = vector.load %arg3[%c0_3, %c0_4, %c0_5] : memref<1x96x128xf32, #tpu.memory_space<vmem>>, vector<1x16x32xf32>
    %3 = vector.shape_cast %2 : vector<1x16x32xf32> to vector<16x32xf32>
    %c0_6 = arith.constant 0 : index
    %c16 = arith.constant 16 : index
    %c0_7 = arith.constant 0 : index
    %4 = vector.load %arg3[%c0_6, %c16, %c0_7] : memref<1x96x128xf32, #tpu.memory_space<vmem>>, vector<1x32x32xf32>
    %5 = vector.shape_cast %4 : vector<1x32x32xf32> to vector<32x32xf32>
    %c0_8 = arith.constant 0 : index
    %c56 = arith.constant 56 : index
    %c0_9 = arith.constant 0 : index
    %6 = vector.load %arg3[%c0_8, %c56, %c0_9] : memref<1x96x128xf32, #tpu.memory_space<vmem>>, vector<1x32x16xf32>
    %7 = vector.shape_cast %6 : vector<1x32x16xf32> to vector<32x16xf32>
    %c0_10 = arith.constant 0 : index
    %c88 = arith.constant 88 : index
    %c0_11 = arith.constant 0 : index
    %8 = vector.load %arg3[%c0_10, %c88, %c0_11] : memref<1x96x128xf32, #tpu.memory_space<vmem>>, vector<1x1x32xf32>
    %9 = vector.shape_cast %8 : vector<1x1x32xf32> to vector<1x32xf32>
    %c0_12 = arith.constant 0 : index
    %c89 = arith.constant 89 : index
    %c0_13 = arith.constant 0 : index
    %10 = vector.load %arg3[%c0_12, %c89, %c0_13] : memref<1x96x128xf32, #tpu.memory_space<vmem>>, vector<1x1x32xf32>
    %11 = vector.shape_cast %10 : vector<1x1x32xf32> to vector<1x32xf32>
    %c0_14 = arith.constant 0 : index
    %c90 = arith.constant 90 : index
    %c0_15 = arith.constant 0 : index
    %12 = vector.load %arg3[%c0_14, %c90, %c0_15] : memref<1x96x128xf32, #tpu.memory_space<vmem>>, vector<1x1x32xf32>
    %13 = vector.shape_cast %12 : vector<1x1x32xf32> to vector<1x32xf32>
    %c0_16 = arith.constant 0 : index
    %c91 = arith.constant 91 : index
    %c0_17 = arith.constant 0 : index
    %14 = vector.load %arg3[%c0_16, %c91, %c0_17] : memref<1x96x128xf32, #tpu.memory_space<vmem>>, vector<1x1x32xf32>
    %15 = vector.shape_cast %14 : vector<1x1x32xf32> to vector<1x32xf32>
    %c0_18 = arith.constant 0 : index
    %c92 = arith.constant 92 : index
    %c0_19 = arith.constant 0 : index
    %16 = vector.load %arg3[%c0_18, %c92, %c0_19] : memref<1x96x128xf32, #tpu.memory_space<vmem>>, vector<1x1x16xf32>
    %17 = vector.shape_cast %16 : vector<1x1x16xf32> to vector<1x16xf32>
    %c0_20 = arith.constant 0 : index
    %c93 = arith.constant 93 : index
    %c0_21 = arith.constant 0 : index
    %18 = vector.load %arg3[%c0_20, %c93, %c0_21] : memref<1x96x128xf32, #tpu.memory_space<vmem>>, vector<1x1x16xf32>
    %19 = vector.shape_cast %18 : vector<1x1x16xf32> to vector<1x16xf32>
    %c0_22 = arith.constant 0 : index
    %c94 = arith.constant 94 : index
    %c0_23 = arith.constant 0 : index
    %20 = vector.load %arg3[%c0_22, %c94, %c0_23] : memref<1x96x128xf32, #tpu.memory_space<vmem>>, vector<1x1x1xf32>
    %21 = vector.shape_cast %20 : vector<1x1x1xf32> to vector<1x1xf32>
    %cst = arith.constant dense<0.000000e+00> : vector<8x32xf32>
    %22 = tpu.matmul %0, %3, %cst {dimension_numbers = #tpu.dot_dimension_numbers<[1], [0], [0], [1], [0, 0, 1, 1], [], []>} : vector<8x16xf32>, vector<16x32xf32>, vector<8x32xf32> -> vector<8x32xf32>
    %23 = vector.broadcast %9 : vector<1x32xf32> to vector<8x32xf32>
    %24 = arith.addf %22, %23 : vector<8x32xf32>
    %cst_24 = arith.constant dense<0.000000e+00> : vector<32xf32>
    %25 = vector.multi_reduction <add>, %24, %cst_24 [0] : vector<8x32xf32> to vector<32xf32>
    %26 = vector.shape_cast %25 : vector<32xf32> to vector<1x32xf32>
    %cst_25 = arith.constant 1.250000e-01 : f32
    %27 = vector.broadcast %cst_25 : f32 to vector<1x32xf32>
    %28 = arith.mulf %26, %27 : vector<1x32xf32>
    %29 = vector.broadcast %28 : vector<1x32xf32> to vector<8x32xf32>
    %30 = arith.subf %24, %29 : vector<8x32xf32>
    %31 = arith.mulf %30, %30 : vector<8x32xf32>
    %cst_26 = arith.constant dense<0.000000e+00> : vector<32xf32>
    %32 = vector.multi_reduction <add>, %31, %cst_26 [0] : vector<8x32xf32> to vector<32xf32>
    %33 = vector.shape_cast %32 : vector<32xf32> to vector<1x32xf32>
    %cst_27 = arith.constant 1.250000e-01 : f32
    %34 = vector.broadcast %cst_27 : f32 to vector<1x32xf32>
    %35 = arith.mulf %33, %34 : vector<1x32xf32>
    %cst_28 = arith.constant 9.99999974E-6 : f32
    %36 = vector.broadcast %cst_28 : f32 to vector<1x32xf32>
    %37 = arith.addf %35, %36 : vector<1x32xf32>
    %38 = math.rsqrt %37 : vector<1x32xf32>
    %39 = vector.broadcast %38 : vector<1x32xf32> to vector<8x32xf32>
    %40 = arith.mulf %30, %39 : vector<8x32xf32>
    %41 = vector.broadcast %11 : vector<1x32xf32> to vector<8x32xf32>
    %42 = arith.mulf %40, %41 : vector<8x32xf32>
    %43 = vector.broadcast %13 : vector<1x32xf32> to vector<8x32xf32>
    %44 = arith.addf %42, %43 : vector<8x32xf32>
    %cst_29 = arith.constant 0.00999999977 : f32
    %45 = vector.broadcast %cst_29 : f32 to vector<8x32xf32>
    %46 = arith.mulf %45, %44 : vector<8x32xf32>
    %47 = arith.maximumf %44, %46 : vector<8x32xf32>
    %cst_30 = arith.constant dense<0.000000e+00> : vector<8x32xf32>
    %48 = tpu.matmul %47, %5, %cst_30 {dimension_numbers = #tpu.dot_dimension_numbers<[1], [0], [0], [1], [0, 0, 1, 1], [], []>} : vector<8x32xf32>, vector<32x32xf32>, vector<8x32xf32> -> vector<8x32xf32>
    %49 = vector.broadcast %15 : vector<1x32xf32> to vector<8x32xf32>
    %50 = arith.addf %48, %49 : vector<8x32xf32>
    %51 = vector.extract_strided_slice %1 {offsets = [0, 0], sizes = [8, 1], strides = [1, 1]} : vector<8x4xf32> to vector<8x1xf32>
    %c0_31 = arith.constant 0 : index
    %c48 = arith.constant 48 : index
    %c0_32 = arith.constant 0 : index
    %52 = vector.load %arg3[%c0_31, %c48, %c0_32] : memref<1x96x128xf32, #tpu.memory_space<vmem>>, vector<1x1x32xf32>
    %53 = vector.shape_cast %52 : vector<1x1x32xf32> to vector<1x32xf32>
    %54 = vector.broadcast %51 : vector<8x1xf32> to vector<8x32xf32>
    %55 = vector.broadcast %53 : vector<1x32xf32> to vector<8x32xf32>
    %56 = arith.mulf %54, %55 : vector<8x32xf32>
    %57 = arith.addf %50, %56 : vector<8x32xf32>
    %58 = vector.extract_strided_slice %1 {offsets = [0, 1], sizes = [8, 1], strides = [1, 1]} : vector<8x4xf32> to vector<8x1xf32>
    %c0_33 = arith.constant 0 : index
    %c49 = arith.constant 49 : index
    %c0_34 = arith.constant 0 : index
    %59 = vector.load %arg3[%c0_33, %c49, %c0_34] : memref<1x96x128xf32, #tpu.memory_space<vmem>>, vector<1x1x32xf32>
    %60 = vector.shape_cast %59 : vector<1x1x32xf32> to vector<1x32xf32>
    %61 = vector.broadcast %58 : vector<8x1xf32> to vector<8x32xf32>
    %62 = vector.broadcast %60 : vector<1x32xf32> to vector<8x32xf32>
    %63 = arith.mulf %61, %62 : vector<8x32xf32>
    %64 = arith.addf %57, %63 : vector<8x32xf32>
    %65 = vector.extract_strided_slice %1 {offsets = [0, 2], sizes = [8, 1], strides = [1, 1]} : vector<8x4xf32> to vector<8x1xf32>
    %c0_35 = arith.constant 0 : index
    %c50 = arith.constant 50 : index
    %c0_36 = arith.constant 0 : index
    %66 = vector.load %arg3[%c0_35, %c50, %c0_36] : memref<1x96x128xf32, #tpu.memory_space<vmem>>, vector<1x1x32xf32>
    %67 = vector.shape_cast %66 : vector<1x1x32xf32> to vector<1x32xf32>
    %68 = vector.broadcast %65 : vector<8x1xf32> to vector<8x32xf32>
    %69 = vector.broadcast %67 : vector<1x32xf32> to vector<8x32xf32>
    %70 = arith.mulf %68, %69 : vector<8x32xf32>
    %71 = arith.addf %64, %70 : vector<8x32xf32>
    %72 = vector.extract_strided_slice %1 {offsets = [0, 3], sizes = [8, 1], strides = [1, 1]} : vector<8x4xf32> to vector<8x1xf32>
    %c0_37 = arith.constant 0 : index
    %c51 = arith.constant 51 : index
    %c0_38 = arith.constant 0 : index
    %73 = vector.load %arg3[%c0_37, %c51, %c0_38] : memref<1x96x128xf32, #tpu.memory_space<vmem>>, vector<1x1x32xf32>
    %74 = vector.shape_cast %73 : vector<1x1x32xf32> to vector<1x32xf32>
    %75 = vector.broadcast %72 : vector<8x1xf32> to vector<8x32xf32>
    %76 = vector.broadcast %74 : vector<1x32xf32> to vector<8x32xf32>
    %77 = arith.mulf %75, %76 : vector<8x32xf32>
    %78 = arith.addf %71, %77 : vector<8x32xf32>
    %cst_39 = arith.constant 0.00999999977 : f32
    %79 = vector.broadcast %cst_39 : f32 to vector<8x32xf32>
    %80 = arith.mulf %79, %78 : vector<8x32xf32>
    %81 = arith.maximumf %78, %80 : vector<8x32xf32>
    %cst_40 = arith.constant dense<0.000000e+00> : vector<8x16xf32>
    %82 = tpu.matmul %81, %7, %cst_40 {dimension_numbers = #tpu.dot_dimension_numbers<[1], [0], [0], [1], [0, 0, 1, 1], [], []>} : vector<8x32xf32>, vector<32x16xf32>, vector<8x16xf32> -> vector<8x16xf32>
    %83 = vector.broadcast %17 : vector<1x16xf32> to vector<8x16xf32>
    %84 = arith.addf %82, %83 : vector<8x16xf32>
    %cst_41 = arith.constant 0.00999999977 : f32
    %85 = vector.broadcast %cst_41 : f32 to vector<8x16xf32>
    %86 = arith.mulf %85, %84 : vector<8x16xf32>
    %87 = arith.maximumf %84, %86 : vector<8x16xf32>
    %88 = vector.broadcast %19 : vector<1x16xf32> to vector<8x16xf32>
    %89 = arith.mulf %87, %88 : vector<8x16xf32>
    %cst_42 = arith.constant dense<0.000000e+00> : vector<8xf32>
    %90 = vector.multi_reduction <add>, %89, %cst_42 [1] : vector<8x16xf32> to vector<8xf32>
    %91 = vector.shape_cast %90 : vector<8xf32> to vector<8x1xf32>
    %92 = vector.broadcast %21 : vector<1x1xf32> to vector<8x1xf32>
    %93 = arith.addf %91, %92 : vector<8x1xf32>
    %c0_43 = arith.constant 0 : index
    %c0_44 = arith.constant 0 : index
    %c0_45 = arith.constant 0 : index
    %94 = vector.load %arg4[%c0_43, %c0_44, %c0_45] : memref<1x8x1xf32, #tpu.memory_space<vmem>>, vector<1x8x1xf32>
    %95 = vector.shape_cast %94 : vector<1x8x1xf32> to vector<8x1xf32>
    %96 = vector.shape_cast %93 : vector<8x1xf32> to vector<1x8x1xf32>
    tpu.vector_store %arg4[%c0_43, %c0_44, %c0_45], %96 {strides = array<i32>} : memref<1x8x1xf32, #tpu.memory_space<vmem>>, vector<1x8x1xf32>,
    return
  }
  func.func @transform_0(%arg0: i32) -> (i32, i32) {
    %c0_i32 = arith.constant 0 : i32
    %c0_i32_0 = arith.constant 0 : i32
    %c0_i32_1 = arith.constant 0 : i32
    return %c0_i32, %c0_i32_0 : i32, i32
  }
  func.func @transform_1(%arg0: i32) -> (i32, i32) {
    %c0_i32 = arith.constant 0 : i32
    %c0_i32_0 = arith.constant 0 : i32
    %c0_i32_1 = arith.constant 0 : i32
    return %c0_i32, %c0_i32_0 : i32, i32
  }
  func.func @transform_2(%arg0: i32) -> (i32, i32, i32) {
    %c0_i32 = arith.constant 0 : i32
    %c0_i32_0 = arith.constant 0 : i32
    %c0_i32_1 = arith.constant 0 : i32
    return %arg0, %c0_i32, %c0_i32_0 : i32, i32, i32
  }
  func.func @transform_3(%arg0: i32) -> (i32, i32, i32) {
    %c0_i32 = arith.constant 0 : i32
    %c0_i32_0 = arith.constant 0 : i32
    %c0_i32_1 = arith.constant 0 : i32
    return %arg0, %c0_i32, %c0_i32_0 : i32, i32, i32
  }
}

</mosaic_0001>

<bundles_post_ra>
// kernel: tpu_custom_call.1
= control target key start
LH: loop header
LB: loop body
LE: loop exit
PB: predicated region body
PF: predicated region fallthrough
CT: control target
= control target key end

     0   :  { %8 = vsyncpa [#allocation3], 0  ;;  %s984_s0 = inlined_call_operand.vmem [shape: f32[8,16], index: 0, kind: input, shape index: {}]   ;;  %s985_s1 = inlined_call_operand.vmem [shape: f32[8,4], index: 1, kind: input, shape index: {}]   ;;  %s986_s2 = inlined_call_operand.hbm [shape: f32[2,96,128], index: 2, kind: input, shape index: {}]   ;;  %s987_s3 = inlined_call_operand.vmem [shape: f32[2,8,1], index: 3, kind: output, shape index: {}]  }
   0x1   :  { %10 = vsyncpa [#allocation3 + $0x1], 0  ;;  %s836_s12 = smov 0   ;;  %s838_s13 = smov 0  }
   0x2   :  { %s840_s14 = smov 0   ;;  %s842_s15 = smov 0  }
   0x3 LB: > { %s855_s16 = sadd.s32 4294967295, %s804_s15   ;;  %s858_s17 = sadd.s32 1, %s804_s15   ;;  %s804_s15 = sphi %s842_s15, %s994_s15   ;;  %s800_s14 = sphi %s840_s14, %s993_s14   ;;  %s796_s13 = sphi %s838_s13, %s992_s13   ;;  %s792_s12 = sphi %s836_s12, %s991_s12  }
   0x4   : > { %s62_s18 = ssub.s32 %s804_s15, %s858_s17  ;;  %s65_s19 = sadd.s32 1, %s800_s14 }
   0x5   : > { %p63_p0 = scmp.eq.s32.totalorder %s62_s18, 0  ;;  %p72_p1 = scmp.ne.s32.totalorder %s800_s14, %s796_s13 }
   0x6   : > { %p73_p2 = scmp.eq.s32.totalorder %s804_s15, 0  ;;  %p78_p3 = scmp.ne.s32.totalorder %s796_s13, %s792_s12 }
   0x7   : > { %s868_s20 = scalar_select %p63_p0, %s800_s14, %s65_s19  }
   0x8   : > { %p74_p4 = por %p73_p2, %p72_p1  ;;  %p79_p5 = scmp.eq.s32.totalorder %s855_s16, 0 }
   0x9   : > { %p691_p6 = scmp.lt.s32.totalorder %s804_s15, 2  ;;  %s134_s22 = sand.u32 1, %s800_s14  }
   0xa   : > { %p872_p7 = por %p79_p5, %p78_p3  ;;  %s682_s23 = smul.u32 96, %s134_s22 }
   0xb   : > { %s683_s24 = smul.u32 1536, %s804_s15  ;;  %p878_p8 = pnand %p691_p6, %p74_p4 }
   0xc   : > { %s138_s29 = scalar_lea.vmem [#allocation2], %s682_s23  ;;  %s890_s4 = scalar_lea.sflag [#allocation3], %s134_s22 }
   0xd   : > { %s885_s28 = scalar_lea.hbm %s986_s2, %s683_s24  ;;  %s145_s30 = sshll.u32 %s138_s29, 4  ;;  %s887_s30 = int_to_ptr.vmem [resolvable:$true] %s145_s30 }
   0xe   : > { %s740_s5 = scalar_lea.hbm %s885_s28, 1536  ;;  %p742_p11 = pneg %p878_p8 }
   0xf   : > { %p741_p10 = scmp.ne.s32.totalorder %s885_s28, %s740_s5  ;;  %s745_s8 = scalar_lea.hbm %s986_s2, 3072 }
  0x10   : > { %p746_p0 = scmp.lt.u32.totalorder %s885_s28, %s986_s2  ;;  %p747_p1 = scmp.lt.u32.totalorder %s745_s8, %s740_s5 }
  0x11   : > { %p743_p12 = pnand %p742_p11, %p741_p10  ;;  %p749_p3 = scmp.lt.u32.totalorder %s740_s5, %s885_s28 }
  0x12   : > { %p748_p2 = por %p747_p1, %p746_p0 }
  0x13   : > { %p744_p13 = pneg %p743_p12 }
  0x14   : > { %p750_p4 = por %p749_p3, %p748_p2 }
  0x16   : > { %p751_p5 = pnand %p750_p4, %p744_p13 }
  0x18   : > { %754 = shalt.err (!%p751_p5)
}
  0x19   : > { %s755_s11 = scalar_lea.vmem %s887_s30, 1536  ;;  %s806_s12 = smov [#allocation2]  }
  0x1a   : > { %p756_p6 = scmp.ne.s32.totalorder %s887_s30, %s755_s11  ;;  %s760_s18 = sshll.u32 %s806_s12, 4  ;;  %s761_s18 = int_to_ptr.vmem [resolvable:$false] %s760_s18 }
  0x1b   : > { %s762_s19 = scalar_lea.vmem %s761_s18, 3072  ;;  %p763_p9 = scmp.lt.s32.totalorder %s887_s30, %s761_s18 }
  0x1c   : > { %p758_p10 = pnand %p756_p6, %p742_p11  ;;  %p764_p0 = scmp.lt.s32.totalorder %s762_s19, %s755_s11 }
  0x1e   : > { %p759_p12 = pneg %p758_p10  ;;  %p765_p1 = por %p764_p0, %p763_p9 }
  0x20   : > { %p766_p2 = pnand %p765_p1, %p759_p12 }
  0x22   : > { %769 = shalt.err (!%p766_p2)
}
  0x23   : > { %s807_s22 = smov 128   ;;  %s808_s23 = smov 8  }
  0x24   : > { %690 = dma.hbm_to_vmem [thread:$0]  (!%p878_p8), %s885_s28, 1536, %s887_s30, %s890_s4, %s807_s22, %s807_s22, %s808_s23  }
  0x25   : > { %p153_p11 = scmp.lt.s32.totalorder %s804_s15, 3  ;;  %p990_p13 = scmp.ge.s32.totalorder %s804_s15, 1 }
  0x27   : > { %p154_p3 = pnand %p990_p13, %p153_p11 }
  0x28   : > { %s159_s24 = sand.u32 (!%p154_p3), 1, %s796_s13  }
  0x29   : > { %157 = sbr.rel (%p154_p3) target bundleno = 918 (0x396), region = 32  ;;  %s160_s27 = scalar_lea.sflag (!%p154_p3), [#allocation3], %s159_s24 }
  0x2a   : > { %s684_s26 = smul.u32 (!%p154_p3), 96, %s159_s24 }
  0x2c   : > { %s922_s29 = scalar_lea.vmem (!%p154_p3), [#allocation2], %s684_s26 }
  0x30   : > { %787 = dma.done.wait (%p872_p7), %s160_s27, 1536  }
  0x31   : > { %789 = vsyncadd (%p872_p7), %s160_s27, 4294965760  ;;  %v809_v0 = vmov 0.0|0.0   ;;  %vm810_vm0 = vmmov 0   ;;  %v811_v1 = vmov 0.0   ;;  %v191_v2 = vld [vmem:[%s922_s29] sm:$0xff]  ;;  %v192_v3 = vld [vmem:[%s922_s29 + $0x8] sm:$0xff] }
  0x32   : > { %667 = vmatprep.subr.bf16.mxu0 %v809_v0  ;;  %642 = vmatprep.mubr.msk.f32.mxu0 %vm810_vm0, %v811_v1  ;;  %v668_v4 = vpack.c.bf16 %v192_v3, %v191_v2  ;;  %v189_v5 = vld [vmem:[%s984_s0] sm:$0xff]  ;;  %vm212_vm1 = vcmask 130048   ;;  %v193_v6 = vld [vmem:[%s922_s29 + $0x10] sm:$0xff]  ;;  %v194_v7 = vld [vmem:[%s922_s29 + $0x18] sm:$0xff]  ;;  %v812_v13 = vmov 0   ;;  %v813_v14 = vmov 2  }
  0x33   : > { %670 = vmatprep.subr.bf16.mxu1 %v809_v0  ;;  %653 = vmatprep.mubr.msk.f32.mxu1 %vm810_vm0, %v811_v1  ;;  %v671_v8 = vpack.c.bf16 %v194_v7, %v193_v6  ;;  %v195_v9 = vld [vmem:[%s922_s29 + $0x20] sm:$0xff]  ;;  %v196_v10 = vld [vmem:[%s922_s29 + $0x28] sm:$0xff]  ;;  %v814_v15 = vmov 1   ;;  %v815_v16 = vmov 3   ;;  %v609_v17 = vld [vmem:[%s922_s29 + $0x58] ss:$0 sm:$0xff] }
  0x34   : > { %669 = vmatpush3.bf16.msra.mxu0 %v668_v4  ;;  %v674_v11 = vpack.c.bf16 %v196_v10, %v195_v9  ;;  %v190_v12 = vld [vmem:[%s985_s1] sm:$0xff]  ;;  %733 = vset.pattern.permute.xlu0 %v812_v13  ;;  %vm286_vm2 = vcmask 261120   ;;  %v611_v41 = vld [vmem:[%s922_s29 + $0x59] ss:$0 sm:$0xff]  ;;  %v612_v43 = vld [vmem:[%s922_s29 + $0x5a] ss:$0 sm:$0xff] }
  0x35   : > { %676 = vmatprep.subr.bf16.mxu0 %v809_v0  ;;  %672 = vmatpush3.bf16.msra.mxu1 %v671_v8  ;;  %v197_v48 = vld [vmem:[%s922_s29 + $0x38] sm:$0xff]  ;;  %v198_v49 = vld [vmem:[%s922_s29 + $0x40] sm:$0xff]  ;;  %v199_v51 = vld [vmem:[%s922_s29 + $0x48] sm:$0xff]  ;;  %p185_p7 = scmp.lt.s32.totalorder %s855_s16, 1  ;;  %vm536_vm3 = vcmask 7168  }
  0x36   : > { %673 = vmatprep.subr.bf16.mxu1 %v809_v0  ;;  %735 = vset.pattern.permute.xlu1 %v813_v14  ;;  %v677_v50 = vpack.c.bf16 %v198_v49, %v197_v48  ;;  %v200_v52 = vld [vmem:[%s922_s29 + $0x50] sm:$0xff]  ;;  %v613_v57 = vld [vmem:[%s922_s29 + $0x5b] ss:$0 sm:$0xff] }
  0x37   : > { %643 = vmatmul.mubr.msk.f32.vlgmr.msra.gmra.mrb[0].mxu0 %vm212_vm1, %v189_v5  ;;  %400 = vperm.xlu0 %733, %v190_v12   ;;  %v680_v53 = vpack.c.bf16 %v200_v52, %v199_v51  ;;  %v615_v56 = vld [vmem:[%s922_s29 + $0x30] ss:$0 sm:$0xff]  ;;  %v616_v58 = vld [vmem:[%s922_s29 + $0x31] ss:$0 sm:$0xff]  ;;  %v617_v2 = vld [vmem:[%s922_s29 + $0x32] ss:$0 sm:$0xff] }
  0x38   : > { %664 = vmatprep.mubr.msk.f32.mxu0 %vm810_vm0, %v811_v1  ;;  %422 = vperm.xlu1 %735, %v190_v12   ;;  %s996_s16 = smov (!%p185_p7, %s855_s16), 1 }
  0x39   : > { %675 = vmatpush3.bf16.msra.mxu1 %v674_v11  ;;  %678 = vmatpush3.bf16.msra.mxu0 %v677_v50  ;;  %s608_s30 = sshll.u32 %s996_s16, 3 }
  0x3a   : > { %679 = vmatprep.subr.bf16.mxu0 %v809_v0  ;;  %v618_v0 = vld [vmem:[%s922_s29 + $0x33] ss:$0 sm:$0xff]  ;;  %s188_s6 = scalar_lea.vmem %s987_s3, %s608_s30 }
  0x3b   : > { %734 = vset.pattern.permute.xlu0 %v814_v15 }
  0x3c   : > { %736 = vset.pattern.permute.xlu1 %v815_v16  ;;  %411 = vperm.xlu0 %734, %v190_v12  }
  0x3d   : > { %433 = vperm.xlu1 %736, %v190_v12   ;;  %681 = vmatpush3.bf16.msra.mxu0 %v680_v53  ;;  %v619_v12 = vld [vmem:[%s922_s29 + $0x5c] ss:$0 sm:$0xff] }
  0x40   : > { %737 = vset.pattern.permute.xlu0 %v815_v16 }
  0xb6   : > { %v401_v54 = vpop.permute.xlu0 %400 }
  0xb7   : > { %v423_v55 = vpop.permute.xlu1 %422  ;;  %v407_v61 = vmul.f32 %v615_v56, %v401_v54 }
  0xb8   : > { %v429_v5 = vmul.f32 %v617_v2, %v423_v55 }
  0xbb   : > { %v412_v59 = vpop.permute.xlu0 %411 }
  0xbc   : > { %v418_v1 = vmul.f32 %v616_v58, %v412_v59  ;;  %v434_v3 = vpop.permute.xlu1 %433 }
  0xbd   : > { %v440_v7 = vmul.f32 %v618_v0, %v434_v3 }
 0x10a   : > { %v282_v18 = vpop.f32.mrb[0].mxu0 }
 0x10b   : > { %v283_v19 = vadd.f32 %v609_v17, %v282_v18  ;;  %v644_v20 = vpop.f32.mrb[1].mxu0  ;;  %v621_v17 = vld [vmem:[%s922_s29 + $0x5d] ss:$0 sm:$0xff] }
 0x10d   : > { %v287_v21 = vsel %vm286_vm2, %v283_v19, 0.0 }
 0x10e   : > { %v288_v22 = vrot.slane %v287_v21, 4 }
 0x110   : > { %v289_v23 = vadd.f32 %v288_v22, %v287_v21  ;;  %v622_v21 = vld [vmem:[%s922_s29 + $0x5e] ss:$0 sm:$0xff] }
 0x112   : > { %v290_v24 = vrot.slane %v289_v23, 2 }
 0x114   : > { %v291_v25 = vadd.f32 %v290_v24, %v289_v23 }
 0x116   : > { %v292_v26 = vrot.slane %v291_v25, 1 }
 0x118   : > { %v293_v27 = vadd.f32 %v292_v26, %v291_v25 }
 0x11a   : > { %v294_v28 = vmul.f32 0.125, %v293_v27 }
 0x11c   : > { %v295_v29 = vsub.f32 %v283_v19, %v294_v28 }
 0x11e   : > { %v296_v30 = vmul.f32 %v295_v29, %v295_v29 }
 0x120   : > { %v297_v31 = vsel %vm286_vm2, %v296_v30, 0.0 }
 0x121   : > { %v298_v32 = vrot.slane %v297_v31, 4 }
 0x123   : > { %v299_v33 = vadd.f32 %v298_v32, %v297_v31 }
 0x125   : > { %v300_v34 = vrot.slane %v299_v33, 2 }
 0x127   : > { %v301_v35 = vadd.f32 %v300_v34, %v299_v33 }
 0x129   : > { %v302_v36 = vrot.slane %v301_v35, 1 }
 0x12b   : > { %v303_v37 = vadd.f32 %v302_v36, %v301_v35 }
 0x12d   : > { %v304_v38 = vmul.f32 0.125, %v303_v37 }
 0x12f   : > { %v305_v39 = vadd.f32 1e-05, %v304_v38 }
 0x131   : > { %738 = vrsqrt.f32 %v305_v39 }
 0x13b   : > { %v739_v40 = vpop.eup %738 }
 0x13c   : > { %v307_v42 = vmul.f32 %v739_v40, %v295_v29 }
 0x13e   : > { %v312_v44 = vmul.f32 %v611_v41, %v307_v42 }
 0x140   : > { %v317_v45 = vadd.f32 %v612_v43, %v312_v44 }
 0x142   : > { %v318_v46 = vmul.f32 0.01, %v317_v45 }
 0x144   : > { %v319_v47 = vmax.f32 %v317_v45, %v318_v46 }
 0x146   : > { %654 = vmatmul.mubr.msk.f32.vlgmr.msra.gmra.mrb[0].mxu1 %vm286_vm2, %v319_v47 }
 0x219   : > { %v393_v60 = vpop.f32.mrb[0].mxu1 }
 0x21a   : > { %v394_v62 = vadd.f32 %v613_v57, %v393_v60  ;;  %v655_v63 = vpop.f32.mrb[1].mxu1 }
 0x21c   : > { %v408_v4 = vadd.f32 %v407_v61, %v394_v62 }
 0x21e   : > { %v419_v6 = vadd.f32 %v418_v1, %v408_v4 }
 0x220   : > { %v430_v8 = vadd.f32 %v429_v5, %v419_v6 }
 0x222   : > { %v441_v9 = vadd.f32 %v440_v7, %v430_v8 }
 0x224   : > { %v442_v10 = vmul.f32 0.01, %v441_v9 }
 0x226   : > { %v443_v11 = vmax.f32 %v441_v9, %v442_v10 }
 0x228   : > { %665 = vmatmul.mubr.msk.f32.vlgmr.msra.gmra.mrb[2].mxu0 %vm286_vm2, %v443_v11 }
 0x2fb   : > { %v517_v13 = vpop.f32.mrb[2].mxu0 }
 0x2fc   : > { %v518_v14 = vadd.f32 %v619_v12, %v517_v13  ;;  %v666_v15 = vpop.f32.mrb[3].mxu0 }
 0x2fe   : > { %v521_v16 = vmul.f32 0.01, %v518_v14 }
 0x300   : > { %v522_v18 = vmax.f32 %v518_v14, %v521_v16 }
 0x302   : > { %v527_v19 = vmul.f32 %v621_v17, %v522_v18 }
 0x304   : > { %v528_v20 = vsel %vm212_vm1, %v527_v19, 0.0 }
 0x305   : > { %529 = vadd.xlane.f32.xlu1 %v528_v20 }
 0x392   : > { %v530_v22 = vpop.xlane.xlu1 %529 }
 0x393   : > { %v535_v23 = vadd.f32 %v622_v21, %v530_v22 }
 0x395   : > { %537 = vst.msk [vmem:[%s188_s6] sm:$0xff] %vm536_vm3, %v535_v23 }
 0x396 PF: > { %p13_p8 = scmp.ge.s32.totalorder %s858_s17, 4   ;;  %s991_s12 = smov %s796_s13 }
 0x397   : > { %s992_s13 = smov %s800_s14  ;;  %s993_s14 = smov %s868_s20 }
 0x398   : > { %s994_s15 = smov %s858_s17  ;;  %15 = sbr.rel (!%p13_p8) target bundleno = 3 (0x3), region = 72 }
 0x39f   :  { %557 = vsyncpa [#allocation3], 1 }
 0x3a0   :  { %559 = vsyncpa [#allocation3 + $0x1], 1 }

</bundles_post_ra>
